<compile_context>
chip_gen: v7x
topology: tpu7x:2x2x1
jax: 0.10.0
libtpu: 0.0.40
codegen_flags: <defaults>
</compile_context>

<pallas_src>
import functools

import jax
import jax.numpy as jnp
from jax.experimental import pallas as pl
from jax.experimental.pallas import tpu as pltpu


def _round_up(x, m):
    return ((x + m - 1) // m) * m


# -----------------------------------------------------------------------------
# Kernels
# -----------------------------------------------------------------------------
def _residual_mlp_kernel_fused(x_ref, w1s_ref, b1s_ref, w2_ref, b2_ref, o_ref,
                               *, co_p):
    """Shortcut is a Linear. w1s = [W1^T | Ws^T] (C_in, 2*co_p): fc1 and the
    shortcut share a single MXU pass over x; the two halves are sliced at a
    lane-tile-aligned boundary (co_p is a multiple of 128)."""
    x = x_ref[...]
    hs = jnp.dot(x, w1s_ref[...], preferred_element_type=jnp.float32) + b1s_ref[...]
    h = jnp.maximum(hs[:, :co_p], 0.0)          # fc1 + relu1
    identity = hs[:, co_p:]                     # shortcut Linear
    out = jnp.dot(h.astype(w2_ref.dtype), w2_ref[...],
                  preferred_element_type=jnp.float32)
    out = jnp.maximum(out + b2_ref[...] + identity, 0.0)   # fc2 + residual + relu2
    o_ref[...] = out.astype(o_ref.dtype)


def _residual_mlp_kernel_identity(x_ref, w1_ref, b1_ref, w2_ref, b2_ref, o_ref):
    """Identity shortcut: add x directly (exact, no eye-matmul, no extra weight)."""
    x = x_ref[...]
    h = jnp.maximum(
        jnp.dot(x, w1_ref[...], preferred_element_type=jnp.float32) + b1_ref[...], 0.0)
    out = jnp.dot(h.astype(w2_ref.dtype), w2_ref[...],
                  preferred_element_type=jnp.float32)
    out = jnp.maximum(out + b2_ref[...] + x, 0.0)
    o_ref[...] = out.astype(o_ref.dtype)


# -----------------------------------------------------------------------------
# One-time parameter preparation (hoisted out of the per-call hot path)
# -----------------------------------------------------------------------------
def prepare_residual_mlp_params(w1, b1, w2, b2, ws=None, bs=None):
    """Inputs use PyTorch nn.Linear convention: w1 (C_out, C_in),
    w2 (C_out, C_out), ws (C_out, C_in), biases 1-D. Returns a param dict with
    pre-transposed, fused, lane-padded f32 weights for the kernel.

    Note: for very large channel counts (C >~ 2000) weights could additionally
    be cast to bf16 (and/or tiled over C_out) to fit v7x's 64 MiB VMEM; at
    these widths f32 residents are kept for exactness.
    """
    c_out, c_in = w1.shape
    co_p = _round_up(c_out, 128)     # lane-dense output width
    po = co_p - c_out
    f32 = jnp.float32

    w2_t = jnp.pad(w2.T.astype(f32), ((0, po), (0, po)))          # (co_p, co_p)
    b2_r = jnp.pad(b2.astype(f32), (0, po)).reshape(1, co_p)

    if ws is not None:
        w1s = jnp.concatenate(
            [jnp.pad(w1.T.astype(f32), ((0, 0), (0, po))),
             jnp.pad(ws.T.astype(f32), ((0, 0), (0, po)))], axis=1)   # (c_in, 2*co_p)
        b1s = jnp.concatenate(
            [jnp.pad(b1.astype(f32), (0, po)),
             jnp.pad(bs.astype(f32), (0, po))]).reshape(1, 2 * co_p)
        return dict(kind="linear", c_in=c_in, c_out=c_out, co_p=co_p,
                    w1s=w1s, b1s=b1s, w2=w2_t, b2=b2_r)

    assert c_in == c_out, "identity shortcut requires in_channels == out_channels"
    w1_t = jnp.pad(w1.T.astype(f32), ((0, po), (0, po)))          # (co_p, co_p)
    b1_r = jnp.pad(b1.astype(f32), (0, po)).reshape(1, co_p)
    return dict(kind="identity", c_in=c_in, c_out=c_out, co_p=co_p,
                w1=w1_t, b1=b1_r, w2=w2_t, b2=b2_r)


# -----------------------------------------------------------------------------
# Forward pass
# -----------------------------------------------------------------------------
def _default_tile_n(n):
    if n >= 1024:
        return 512                                # big, MXU-saturating batch panels
    if n >= 256:
        return _round_up(pl.cdiv(n, 2), 8)        # >=2 grid steps -> both v7x TCs busy
    return _round_up(max(n, 8), 8)                # toy shapes: single tile


def residual_mlp(x, params, *, tile_n=None):
    """x: (N, C_in) f32. params: output of prepare_residual_mlp_params.
    Returns (N, C_out) f32."""
    N, c_in = x.shape
    assert c_in == params["c_in"], "channel mismatch with prepared params"
    c_out, co_p = params["c_out"], params["co_p"]
    kind = params["kind"]

    if tile_n is None:
        tile_n = _default_tile_n(N)
    tile_n = max(8, _round_up(tile_n, 8))
    n_pad = _round_up(N, tile_n)

    x = x.astype(jnp.float32)
    if kind == "identity":
        # x is added directly inside the kernel, so pad its channel axis too.
        xin = jnp.pad(x, ((0, n_pad - N), (0, co_p - c_in)))
        k_in = co_p
        weights = (params["w1"], params["b1"], params["w2"], params["b2"])
        w_shapes = [(co_p, co_p), (1, co_p), (co_p, co_p), (1, co_p)]
        kernel = _residual_mlp_kernel_identity
    else:
        xin = jnp.pad(x, ((0, n_pad - N), (0, 0))) if n_pad != N else x
        k_in = c_in
        weights = (params["w1s"], params["b1s"], params["w2"], params["b2"])
        w_shapes = [(c_in, 2 * co_p), (1, 2 * co_p), (co_p, co_p), (1, co_p)]
        kernel = functools.partial(_residual_mlp_kernel_fused, co_p=co_p)

    grid = (n_pad // tile_n,)

    # VMEM budget: double-buffered x/out tiles + resident weights + temporaries,
    # with 2x margin, never below the 32 MiB default and capped at 64 MiB (v7x).
    itemsize = 4
    w_bytes = sum(a * b for a, b in w_shapes) * itemsize
    stream_bytes = 2 * tile_n * (k_in + co_p) * itemsize
    interm_bytes = 3 * tile_n * 2 * co_p * itemsize
    vmem_limit = int(min(max(2 * (w_bytes + stream_bytes + interm_bytes),
                             32 * 1024 * 1024), 64 * 1024 * 1024))

    def run(single_buffer):
        if single_buffer:
            def res(shape):
                return pl.BlockSpec(shape, lambda i: (0, 0),
                                    pipeline_mode=pl.Buffered(1))
        else:
            def res(shape):
                return pl.BlockSpec(shape, lambda i: (0, 0))

        in_specs = ([pl.BlockSpec((tile_n, k_in), lambda i: (i, 0))]
                    + [res(s) for s in w_shapes])
        return pl.pallas_call(
            kernel,
            out_shape=jax.ShapeDtypeStruct((n_pad, co_p), jnp.float32),
            grid_spec=pltpu.PrefetchScalarGridSpec(
                num_scalar_prefetch=0,
                grid=grid,
                in_specs=in_specs,
                out_specs=pl.BlockSpec((tile_n, co_p), lambda i: (i, 0)),
            ),
            compiler_params=pltpu.CompilerParams(
                dimension_semantics=("parallel",),
                vmem_limit_bytes=vmem_limit),
        )(xin, *weights)

    try:
        out = run(single_buffer=True)
    except Exception:
        # Fallback if pl.Buffered(1) single-buffering is unsupported by this
        # jax/Mosaic build; correctness is identical, only VMEM use differs.
        out = run(single_buffer=False)

    return out[:N, :c_out]


# -----------------------------------------------------------------------------
# Pure-JAX reference mirroring the PyTorch forward
# -----------------------------------------------------------------------------
def residual_mlp_ref(x, w1, b1, w2, b2, ws=None, bs=None):
    identity = x if ws is None else x @ ws.T + bs
    out = jnp.maximum(x @ w1.T + b1, 0.0)
    out = out @ w2.T + b2
    out = out + identity
    return jnp.maximum(out, 0.0)


if __name__ == "__main__":
    # Small shapes: batch=16, in_channels=32, out_channels=64 (shortcut Linear).
    N, C_IN, C_OUT = 16, 32, 64
    key = jax.random.PRNGKey(0)
    kx, k1, kb1, k2, kb2, ks, kbs = jax.random.split(key, 7)

    x = jax.random.normal(kx, (N, C_IN), dtype=jnp.float32)

    def uinit(k, shape, fan_in):  # PyTorch nn.Linear-style uniform init
        bound = 1.0 / (fan_in ** 0.5)
        return jax.random.uniform(k, shape, jnp.float32, -bound, bound)

    w1 = uinit(k1, (C_OUT, C_IN), C_IN)
    b1 = uinit(kb1, (C_OUT,), C_IN)
    w2 = uinit(k2, (C_OUT, C_OUT), C_OUT)
    b2 = uinit(kb2, (C_OUT,), C_OUT)
    ws = uinit(ks, (C_OUT, C_IN), C_IN)
    bs = uinit(kbs, (C_OUT,), C_IN)

    # Linear-shortcut path (in_channels != out_channels), fused fc1||shortcut.
    params = prepare_residual_mlp_params(w1, b1, w2, b2, ws, bs)
    out = jax.block_until_ready(residual_mlp(x, params))
    ref = residual_mlp_ref(x, w1, b1, w2, b2, ws, bs)
    assert out.shape == (N, C_OUT) and out.dtype == jnp.float32
    assert jnp.allclose(out, ref, atol=1e-5, rtol=1e-5), "linear-shortcut mismatch"

    # Identity-shortcut path (in_channels == out_channels), x added directly.
    x_sq = jax.random.normal(kx, (N, C_OUT), dtype=jnp.float32)
    w1_sq = uinit(k1, (C_OUT, C_OUT), C_OUT)
    params_sq = prepare_residual_mlp_params(w1_sq, b1, w2, b2)
    out_sq = jax.block_until_ready(residual_mlp(x_sq, params_sq))
    ref_sq = residual_mlp_ref(x_sq, w1_sq, b1, w2, b2)
    assert jnp.allclose(out_sq, ref_sq, atol=1e-5, rtol=1e-5), "identity-shortcut mismatch"

    # Larger, non-tile-multiple batch: exercises padding + a 2-step parallel grid.
    N2 = 300
    x2 = jax.random.normal(kx, (N2, C_IN), dtype=jnp.float32)
    out2 = jax.block_until_ready(residual_mlp(x2, params))
    ref2 = residual_mlp_ref(x2, w1, b1, w2, b2, ws, bs)
    assert out2.shape == (N2, C_OUT)
    assert jnp.allclose(out2, ref2, atol=1e-5, rtol=1e-5), "padded-batch mismatch"

    print("KERNEL_OK")
</pallas_src>

<mosaic_0001>
module attributes {stable_mosaic.version = 11 : i64} {
  func.func @_residual_mlp_kernel_fused(%arg0: i32, %arg1: memref<16x32xf32, #tpu.memory_space<vmem>>, %arg2: memref<32x256xf32, #tpu.memory_space<vmem>>, %arg3: memref<1x256xf32, #tpu.memory_space<vmem>>, %arg4: memref<128x128xf32, #tpu.memory_space<vmem>>, %arg5: memref<1x128xf32, #tpu.memory_space<vmem>>, %arg6: memref<16x128xf32, #tpu.memory_space<vmem>>) attributes {dimension_semantics = [#tpu.dimension_semantics<parallel>], iteration_bounds = array<i64: 1>, scalar_prefetch = 0 : i64, scratch_operands = 0 : i64, tpu.core_type = #tpu.core_type<tc>, window_params = [{transform_indices = @transform_0, window_bounds = array<i64: 16, 32>}, {pipeline_mode = #tpu.pipeline_mode<synchronous>, transform_indices = @transform_1, window_bounds = array<i64: 32, 256>}, {pipeline_mode = #tpu.pipeline_mode<synchronous>, transform_indices = @transform_2, window_bounds = array<i64: 1, 256>}, {pipeline_mode = #tpu.pipeline_mode<synchronous>, transform_indices = @transform_3, window_bounds = array<i64: 128, 128>}, {pipeline_mode = #tpu.pipeline_mode<synchronous>, transform_indices = @transform_4, window_bounds = array<i64: 1, 128>}, {transform_indices = @transform_5, window_bounds = array<i64: 16, 128>}]} {
    %c0 = arith.constant 0 : index
    %c0_0 = arith.constant 0 : index
    %0 = vector.load %arg1[%c0, %c0_0] : memref<16x32xf32, #tpu.memory_space<vmem>>, vector<16x32xf32>
    %c0_1 = arith.constant 0 : index
    %c0_2 = arith.constant 0 : index
    %1 = vector.load %arg2[%c0_1, %c0_2] : memref<32x256xf32, #tpu.memory_space<vmem>>, vector<32x256xf32>
    %cst = arith.constant dense<0.000000e+00> : vector<16x256xf32>
    %2 = tpu.matmul %0, %1, %cst {dimension_numbers = #tpu.dot_dimension_numbers<[1], [0], [0], [1], [0, 0, 1, 1], [], []>} : vector<16x32xf32>, vector<32x256xf32>, vector<16x256xf32> -> vector<16x256xf32>
    %c0_3 = arith.constant 0 : index
    %c0_4 = arith.constant 0 : index
    %3 = vector.load %arg3[%c0_3, %c0_4] : memref<1x256xf32, #tpu.memory_space<vmem>>, vector<1x256xf32>
    %4 = vector.broadcast %3 : vector<1x256xf32> to vector<16x256xf32>
    %5 = arith.addf %2, %4 : vector<16x256xf32>
    %6 = vector.extract_strided_slice %5 {offsets = [0, 0], sizes = [16, 128], strides = [1, 1]} : vector<16x256xf32> to vector<16x128xf32>
    %cst_5 = arith.constant 0.000000e+00 : f32
    %7 = vector.broadcast %cst_5 : f32 to vector<16x128xf32>
    %8 = arith.maximumf %6, %7 : vector<16x128xf32>
    %9 = vector.extract_strided_slice %5 {offsets = [0, 128], sizes = [16, 128], strides = [1, 1]} : vector<16x256xf32> to vector<16x128xf32>
    %c0_6 = arith.constant 0 : index
    %c0_7 = arith.constant 0 : index
    %10 = vector.load %arg4[%c0_6, %c0_7] : memref<128x128xf32, #tpu.memory_space<vmem>>, vector<128x128xf32>
    %cst_8 = arith.constant dense<0.000000e+00> : vector<16x128xf32>
    %11 = tpu.matmul %8, %10, %cst_8 {dimension_numbers = #tpu.dot_dimension_numbers<[1], [0], [0], [1], [0, 0, 1, 1], [], []>} : vector<16x128xf32>, vector<128x128xf32>, vector<16x128xf32> -> vector<16x128xf32>
    %c0_9 = arith.constant 0 : index
    %c0_10 = arith.constant 0 : index
    %12 = vector.load %arg5[%c0_9, %c0_10] : memref<1x128xf32, #tpu.memory_space<vmem>>, vector<1x128xf32>
    %13 = vector.broadcast %12 : vector<1x128xf32> to vector<16x128xf32>
    %14 = arith.addf %11, %13 : vector<16x128xf32>
    %15 = arith.addf %14, %9 : vector<16x128xf32>
    %cst_11 = arith.constant 0.000000e+00 : f32
    %16 = vector.broadcast %cst_11 : f32 to vector<16x128xf32>
    %17 = arith.maximumf %15, %16 : vector<16x128xf32>
    %c0_12 = arith.constant 0 : index
    %c0_13 = arith.constant 0 : index
    %18 = vector.load %arg6[%c0_12, %c0_13] : memref<16x128xf32, #tpu.memory_space<vmem>>, vector<16x128xf32>
    tpu.vector_store %arg6[%c0_12, %c0_13], %17 {strides = array<i32>} : memref<16x128xf32, #tpu.memory_space<vmem>>, vector<16x128xf32>,
    return
  }
  func.func @transform_0(%arg0: i32) -> (i32, i32) {
    %c0_i32 = arith.constant 0 : i32
    %c0_i32_0 = arith.constant 0 : i32
    return %arg0, %c0_i32 : i32, i32
  }
  func.func @transform_1(%arg0: i32) -> (i32, i32) {
    %c0_i32 = arith.constant 0 : i32
    %c0_i32_0 = arith.constant 0 : i32
    %c0_i32_1 = arith.constant 0 : i32
    return %c0_i32, %c0_i32_0 : i32, i32
  }
  func.func @transform_2(%arg0: i32) -> (i32, i32) {
    %c0_i32 = arith.constant 0 : i32
    %c0_i32_0 = arith.constant 0 : i32
    %c0_i32_1 = arith.constant 0 : i32
    return %c0_i32, %c0_i32_0 : i32, i32
  }
  func.func @transform_3(%arg0: i32) -> (i32, i32) {
    %c0_i32 = arith.constant 0 : i32
    %c0_i32_0 = arith.constant 0 : i32
    %c0_i32_1 = arith.constant 0 : i32
    return %c0_i32, %c0_i32_0 : i32, i32
  }
  func.func @transform_4(%arg0: i32) -> (i32, i32) {
    %c0_i32 = arith.constant 0 : i32
    %c0_i32_0 = arith.constant 0 : i32
    %c0_i32_1 = arith.constant 0 : i32
    return %c0_i32, %c0_i32_0 : i32, i32
  }
  func.func @transform_5(%arg0: i32) -> (i32, i32) {
    %c0_i32 = arith.constant 0 : i32
    %c0_i32_0 = arith.constant 0 : i32
    return %arg0, %c0_i32 : i32, i32
  }
}

module attributes {stable_mosaic.version = 11 : i64} {
  func.func @_residual_mlp_kernel_fused(%arg0: i32, %arg1: memref<16x32xf32, #tpu.memory_space<vmem>>, %arg2: memref<32x256xf32, #tpu.memory_space<vmem>>, %arg3: memref<1x256xf32, #tpu.memory_space<vmem>>, %arg4: memref<128x128xf32, #tpu.memory_space<vmem>>, %arg5: memref<1x128xf32, #tpu.memory_space<vmem>>, %arg6: memref<16x128xf32, #tpu.memory_space<vmem>>) attributes {dimension_semantics = [#tpu.dimension_semantics<parallel>], iteration_bounds = array<i64: 1>, scalar_prefetch = 0 : i64, scratch_operands = 0 : i64, tpu.core_type = #tpu.core_type<tc>, window_params = [{transform_indices = @transform_0, window_bounds = array<i64: 16, 32>}, {pipeline_mode = #tpu.pipeline_mode<synchronous>, transform_indices = @transform_1, window_bounds = array<i64: 32, 256>}, {pipeline_mode = #tpu.pipeline_mode<synchronous>, transform_indices = @transform_2, window_bounds = array<i64: 1, 256>}, {pipeline_mode = #tpu.pipeline_mode<synchronous>, transform_indices = @transform_3, window_bounds = array<i64: 128, 128>}, {pipeline_mode = #tpu.pipeline_mode<synchronous>, transform_indices = @transform_4, window_bounds = array<i64: 1, 128>}, {transform_indices = @transform_5, window_bounds = array<i64: 16, 128>}]} {
    %c0 = arith.constant 0 : index
    %c0_0 = arith.constant 0 : index
    %0 = vector.load %arg1[%c0, %c0_0] : memref<16x32xf32, #tpu.memory_space<vmem>>, vector<16x32xf32>
    %c0_1 = arith.constant 0 : index
    %c0_2 = arith.constant 0 : index
    %1 = vector.load %arg2[%c0_1, %c0_2] : memref<32x256xf32, #tpu.memory_space<vmem>>, vector<32x256xf32>
    %cst = arith.constant dense<0.000000e+00> : vector<16x256xf32>
    %2 = tpu.matmul %0, %1, %cst {dimension_numbers = #tpu.dot_dimension_numbers<[1], [0], [0], [1], [0, 0, 1, 1], [], []>} : vector<16x32xf32>, vector<32x256xf32>, vector<16x256xf32> -> vector<16x256xf32>
    %c0_3 = arith.constant 0 : index
    %c0_4 = arith.constant 0 : index
    %3 = vector.load %arg3[%c0_3, %c0_4] : memref<1x256xf32, #tpu.memory_space<vmem>>, vector<1x256xf32>
    %4 = vector.broadcast %3 : vector<1x256xf32> to vector<16x256xf32>
    %5 = arith.addf %2, %4 : vector<16x256xf32>
    %6 = vector.extract_strided_slice %5 {offsets = [0, 0], sizes = [16, 128], strides = [1, 1]} : vector<16x256xf32> to vector<16x128xf32>
    %cst_5 = arith.constant 0.000000e+00 : f32
    %7 = vector.broadcast %cst_5 : f32 to vector<16x128xf32>
    %8 = arith.maximumf %6, %7 : vector<16x128xf32>
    %9 = vector.extract_strided_slice %5 {offsets = [0, 128], sizes = [16, 128], strides = [1, 1]} : vector<16x256xf32> to vector<16x128xf32>
    %c0_6 = arith.constant 0 : index
    %c0_7 = arith.constant 0 : index
    %10 = vector.load %arg4[%c0_6, %c0_7] : memref<128x128xf32, #tpu.memory_space<vmem>>, vector<128x128xf32>
    %cst_8 = arith.constant dense<0.000000e+00> : vector<16x128xf32>
    %11 = tpu.matmul %8, %10, %cst_8 {dimension_numbers = #tpu.dot_dimension_numbers<[1], [0], [0], [1], [0, 0, 1, 1], [], []>} : vector<16x128xf32>, vector<128x128xf32>, vector<16x128xf32> -> vector<16x128xf32>
    %c0_9 = arith.constant 0 : index
    %c0_10 = arith.constant 0 : index
    %12 = vector.load %arg5[%c0_9, %c0_10] : memref<1x128xf32, #tpu.memory_space<vmem>>, vector<1x128xf32>
    %13 = vector.broadcast %12 : vector<1x128xf32> to vector<16x128xf32>
    %14 = arith.addf %11, %13 : vector<16x128xf32>
    %15 = arith.addf %14, %9 : vector<16x128xf32>
    %cst_11 = arith.constant 0.000000e+00 : f32
    %16 = vector.broadcast %cst_11 : f32 to vector<16x128xf32>
    %17 = arith.maximumf %15, %16 : vector<16x128xf32>
    %c0_12 = arith.constant 0 : index
    %c0_13 = arith.constant 0 : index
    %18 = vector.load %arg6[%c0_12, %c0_13] : memref<16x128xf32, #tpu.memory_space<vmem>>, vector<16x128xf32>
    tpu.vector_store %arg6[%c0_12, %c0_13], %17 {strides = array<i32>} : memref<16x128xf32, #tpu.memory_space<vmem>>, vector<16x128xf32>,
    return
  }
  func.func @transform_0(%arg0: i32) -> (i32, i32) {
    %c0_i32 = arith.constant 0 : i32
    %c0_i32_0 = arith.constant 0 : i32
    return %arg0, %c0_i32 : i32, i32
  }
  func.func @transform_1(%arg0: i32) -> (i32, i32) {
    %c0_i32 = arith.constant 0 : i32
    %c0_i32_0 = arith.constant 0 : i32
    %c0_i32_1 = arith.constant 0 : i32
    return %c0_i32, %c0_i32_0 : i32, i32
  }
  func.func @transform_2(%arg0: i32) -> (i32, i32) {
    %c0_i32 = arith.constant 0 : i32
    %c0_i32_0 = arith.constant 0 : i32
    %c0_i32_1 = arith.constant 0 : i32
    return %c0_i32, %c0_i32_0 : i32, i32
  }
  func.func @transform_3(%arg0: i32) -> (i32, i32) {
    %c0_i32 = arith.constant 0 : i32
    %c0_i32_0 = arith.constant 0 : i32
    %c0_i32_1 = arith.constant 0 : i32
    return %c0_i32, %c0_i32_0 : i32, i32
  }
  func.func @transform_4(%arg0: i32) -> (i32, i32) {
    %c0_i32 = arith.constant 0 : i32
    %c0_i32_0 = arith.constant 0 : i32
    %c0_i32_1 = arith.constant 0 : i32
    return %c0_i32, %c0_i32_0 : i32, i32
  }
  func.func @transform_5(%arg0: i32) -> (i32, i32) {
    %c0_i32 = arith.constant 0 : i32
    %c0_i32_0 = arith.constant 0 : i32
    return %arg0, %c0_i32 : i32, i32
  }
}

</mosaic_0001>

<bundles_post_ra>
// kernel: tpu_custom_call.1
= control target key start
LH: loop header
LB: loop body
LE: loop exit
PB: predicated region body
PF: predicated region fallthrough
CT: control target
= control target key end

     0   :  { %10 = vsyncpa [#allocation3], 0  ;;  %s593_s0 = inlined_call_operand.hbm [shape: f32[16,32], index: 0, kind: input, shape index: {}]   ;;  %s594_s1 = inlined_call_operand.hbm [shape: f32[32,256], index: 1, kind: input, shape index: {}]   ;;  %s595_s2 = inlined_call_operand.vmem [shape: f32[1,256], index: 2, kind: input, shape index: {}]   ;;  %s596_s3 = inlined_call_operand.hbm [shape: f32[128,128], index: 3, kind: input, shape index: {}]   ;;  %s597_s4 = inlined_call_operand.vmem [shape: f32[1,128], index: 4, kind: input, shape index: {}]   ;;  %s598_s5 = inlined_call_operand.hbm [shape: f32[16,128], index: 5, kind: output, shape index: {}]  }
   0x1   :  { %11 = vsyncpa [#allocation6], 0 }
   0x2   :  { %12 = vsyncpa [#allocation4], 0  ;;  %s491_s18 = smov [#allocation5]   ;;  %s397_s22 = scalar_lea.hbm %s594_s1, 1024 }
   0x3   :  { %s30_s19 = sshll.u32 %s491_s18, 4  ;;  %p398_p0 = scmp.ne.s32.totalorder %s594_s1, %s397_s22  ;;  %s31_s19 = int_to_ptr.vmem [resolvable:$true] %s30_s19 }
   0x4   :  { %p401_p1 = scmp.lt.u32.totalorder %s397_s22, %s594_s1 }
   0x6   :  { %p403_p2 = pnand %p401_p1, %p398_p0 }
   0x8   :  { %406 = shalt.err (!%p403_p2)
}
   0x9   :  { %s407_s27 = scalar_lea.vmem %s31_s19, 1024  ;;  %p412_p4 = scmp.lt.s32.totalorder %s31_s19, %s31_s19 }
   0xa   :  { %p408_p3 = scmp.ne.s32.totalorder %s31_s19, %s407_s27  ;;  %p413_p5 = scmp.lt.s32.totalorder %s407_s27, %s407_s27 }
   0xc   :  { %p414_p6 = por %p413_p5, %p412_p4 }
   0xe   :  { %p415_p7 = pnand %p414_p6, %p408_p3 }
  0x10   :  { %418 = shalt.err (!%p415_p7)
}
  0x11   :  { %s492_s28 = smov 256   ;;  %s493_s29 = smov 16  }
  0x12   :  { %36 = dma.hbm_to_vmem [thread:$0]  %s594_s1, 1024, %s31_s19, [#allocation6], %s492_s28, %s492_s28, %s493_s29  }
  0x13   :  { %s494_s7 = smov [#allocation2]   ;;  %s419_s11 = scalar_lea.hbm %s593_s0, 256 }
  0x14   :  { %s18_s8 = sshll.u32 %s494_s7, 4  ;;  %p420_p8 = scmp.ne.s32.totalorder %s593_s0, %s419_s11  ;;  %s19_s8 = int_to_ptr.vmem [resolvable:$true] %s18_s8 }
  0x15   :  { %p423_p9 = scmp.lt.u32.totalorder %s419_s11, %s593_s0 }
  0x17   :  { %p425_p10 = pnand %p423_p9, %p420_p8 }
  0x19   :  { %428 = shalt.err (!%p425_p10)
}
  0x1a   :  { %s429_s16 = scalar_lea.vmem %s19_s8, 256  ;;  %p434_p12 = scmp.lt.s32.totalorder %s19_s8, %s19_s8 }
  0x1b   :  { %p430_p11 = scmp.ne.s32.totalorder %s19_s8, %s429_s16  ;;  %p435_p13 = scmp.lt.s32.totalorder %s429_s16, %s429_s16 }
  0x1d   :  { %p436_p0 = por %p435_p13, %p434_p12 }
  0x1f   :  { %p437_p1 = pnand %p436_p0, %p430_p11 }
  0x21   :  { %440 = shalt.err (!%p437_p1)
}
  0x22   :  { %s495_s1 = smov 128   ;;  %s496_s17 = smov 8  }
  0x23   :  { %24 = dma.hbm_to_vmem [thread:$0]  %s593_s0, 256, %s19_s8, [#allocation3], %s495_s1, %s495_s1, %s496_s17  }
  0x24   :  { %s497_s20 = smov [#allocation7]   ;;  %s441_s24 = scalar_lea.hbm %s596_s3, 2048 }
  0x25   :  { %s44_s21 = sshll.u32 %s497_s20, 4  ;;  %p442_p2 = scmp.ne.s32.totalorder %s596_s3, %s441_s24  ;;  %s45_s21 = int_to_ptr.vmem [resolvable:$true] %s44_s21 }
  0x26   :  { %p445_p3 = scmp.lt.u32.totalorder %s441_s24, %s596_s3 }
  0x28   :  { %p447_p4 = pnand %p445_p3, %p442_p2 }
  0x2a   :  { %450 = shalt.err (!%p447_p4)
}
  0x2b   :  { %s451_s29 = scalar_lea.vmem %s45_s21, 2048  ;;  %p456_p6 = scmp.lt.s32.totalorder %s45_s21, %s45_s21 }
  0x2c   :  { %p452_p5 = scmp.ne.s32.totalorder %s45_s21, %s451_s29  ;;  %p457_p7 = scmp.lt.s32.totalorder %s451_s29, %s451_s29 }
  0x2e   :  { %p458_p8 = por %p457_p7, %p456_p6 }
  0x30   :  { %p459_p9 = pnand %p458_p8, %p452_p5 }
  0x32   :  { %462 = shalt.err (!%p459_p9)
}
  0x33   :  { %50 = dma.hbm_to_vmem [thread:$0]  %s596_s3, 2048, %s45_s21, [#allocation6], %s495_s1, %s495_s1, %s496_s17  }
  0x34   :  { %485 = dma.done.wait [#allocation3], 256  }
  0x35   :  { %486 = vsyncadd [#allocation3], 4294967040 }
  0x36   :  { %487 = dma.done.wait [#allocation6], 3072  }
  0x37   :  { %488 = vsyncadd [#allocation6], 4294964224  ;;  %v498_v0 = vmov 0.0   ;;  %v65_v1 = vld [vmem:[#allocation5 + $0x8] sm:$0xff]  ;;  %v67_v2 = vld [vmem:[#allocation5 + $0x18] sm:$0xff]  ;;  %vm84_vm0 = vcmask 261120   ;;  %v74_v33 = vlaneseq }
  0x38   :  { %155 = vmatprep.mubr.f32.mxu0 %v498_v0  ;;  %v64_v3 = vld [vmem:[#allocation5] sm:$0xff]  ;;  %v348_v4 = vpack.c.bf16 %v67_v2, %v65_v1  ;;  %v66_v5 = vld [vmem:[#allocation5 + $0x10] sm:$0xff]  ;;  %v69_v6 = vld [vmem:[#allocation5 + $0x28] sm:$0xff]  ;;  %s499_s8 = smov [#allocation8]  }
  0x39   :  { %v71_v7 = vld [vmem:[#allocation5 + $0x38] sm:$0xff]  ;;  %v350_v8 = vpack.c.bf16 %v66_v5, %v64_v3  ;;  %v68_v10 = vld [vmem:[#allocation5 + $0x20] sm:$0xff]  ;;  %v70_v11 = vld [vmem:[#allocation5 + $0x30] sm:$0xff]  ;;  %v75_v34 = vshrl.u32 %v74_v33, 7  ;;  %s279_s9 = sshll.u32 %s499_s8, 4  ;;  %s280_s9 = int_to_ptr.vmem [resolvable:$true] %s279_s9 }
  0x3a   :  { %v352_v9 = vpack.c.bf16 %v71_v7, %v69_v6  ;;  %349 = vmatprep.subr.bf16.mxu0 %v348_v4  ;;  %v170_v12 = vld [vmem:[#allocation7] sm:$0xff]  ;;  %v171_v13 = vld [vmem:[#allocation7 + $0x8] sm:$0xff]  ;;  %v354_v14 = vpack.c.bf16 %v70_v11, %v68_v10  ;;  %v172_v16 = vld [vmem:[#allocation7 + $0x10] sm:$0xff]  ;;  %s463_s10 = scalar_lea.vmem %s280_s9, 256  ;;  %p468_p11 = scmp.lt.s32.totalorder %s280_s9, %s280_s9 }
  0x3b   :  { %351 = vmatpush1.bf16.msra.mxu0 %v350_v8  ;;  %v356_v15 = vpack.c.bf16 %v171_v13, %v170_v12  ;;  %v173_v17 = vld [vmem:[#allocation7 + $0x18] sm:$0xff]  ;;  %v174_v19 = vld [vmem:[#allocation7 + $0x20] sm:$0xff]  ;;  %v175_v20 = vld [vmem:[#allocation7 + $0x28] sm:$0xff]  ;;  %v80_v36 = vsub.s32 1, %v75_v34  ;;  %v76_v44 = vsub.s32 0, %v75_v34  ;;  %p464_p10 = scmp.ne.s32.totalorder %s280_s9, %s463_s10  ;;  %p469_p12 = scmp.lt.s32.totalorder %s463_s10, %s463_s10 }
  0x3c   :  { %353 = vmatprep.subr.bf16.mxu0 %v352_v9  ;;  %v360_v18 = vpack.c.bf16 %v173_v17, %v172_v16  ;;  %v62_v21 = vld [vmem:[#allocation2] sm:$0xff]  ;;  %v364_v22 = vpack.c.bf16 %v175_v20, %v174_v19  ;;  %v177_v24 = vld [vmem:[#allocation7 + $0x38] sm:$0xff]  ;;  %v178_v27 = vld [vmem:[#allocation7 + $0x40] sm:$0xff] }
  0x3d   :  { %357 = vmatprep.subr.bf16.mxu1 %v356_v15  ;;  %v176_v23 = vld [vmem:[#allocation7 + $0x30] sm:$0xff]  ;;  %v63_v25 = vld [vmem:[#allocation2 + $0x8] sm:$0xff]  ;;  %v179_v28 = vld [vmem:[#allocation7 + $0x48] sm:$0xff]  ;;  %p470_p13 = por %p469_p12, %p468_p11 }
  0x3e   :  { %359 = vmatpush3.bf16.msra.mxu1 %v356_v15  ;;  %v368_v26 = vpack.c.bf16 %v177_v24, %v176_v23  ;;  %v372_v29 = vpack.c.bf16 %v179_v28, %v178_v27  ;;  %v180_v30 = vld [vmem:[#allocation7 + $0x50] sm:$0xff]  ;;  %v181_v31 = vld [vmem:[#allocation7 + $0x58] sm:$0xff]  ;;  %v182_v37 = vld [vmem:[#allocation7 + $0x60] sm:$0xff] }
  0x3f   :  { %355 = vmatpush1.bf16.msra.mxu0 %v354_v14  ;;  %361 = vmatprep.subr.bf16.mxu1 %v360_v18  ;;  %v376_v32 = vpack.c.bf16 %v181_v31, %v180_v30  ;;  %v72_v35 = vld [vmem:[%s595_s2] sm:$0x3]  ;;  %v183_v38 = vld [vmem:[#allocation7 + $0x68] sm:$0xff]  ;;  %v185_v42 = vld [vmem:[#allocation7 + $0x78] sm:$0xff]  ;;  %p471_p0 = pnand %p470_p13, %p464_p10 }
  0x40   :  { %v380_v39 = vpack.c.bf16 %v183_v38, %v182_v37  ;;  %v81_v40 = vrot.slane %v72_v35, %v80_v36  ;;  %v184_v41 = vld [vmem:[#allocation7 + $0x70] sm:$0xff]  ;;  %v77_v45 = vrot.slane %v72_v35, %v76_v44 }
  0x41   :  { %v384_v43 = vpack.c.bf16 %v185_v42, %v184_v41  ;;  %v294_v56 = vld [vmem:[%s597_s4] ss:$0 sm:$0xff] }
  0x42   :  { %292 = vmatmul.mubr.msk.f32.vlgmr.msra.gmra.mrb[0].mxu0 %vm84_vm0, %v62_v21  ;;  %363 = vmatpush3.bf16.msra.mxu1 %v360_v18 }
  0x43   :  { %161 = vmatprep.mubr.f32.mxu0 %v498_v0  ;;  %365 = vmatprep.subr.bf16.mxu1 %v364_v22 }
  0x46   :  { %293 = vmatmul.mubr.msk.f32.gmra.mrb[2].mxu0 %vm84_vm0, %v63_v25  ;;  %367 = vmatpush3.bf16.msra.mxu1 %v364_v22 }
  0x47   :  { %369 = vmatprep.subr.bf16.mxu1 %v368_v26 }
  0x4a   :  { %371 = vmatpush3.bf16.msra.mxu1 %v368_v26 }
  0x4b   :  { %373 = vmatprep.subr.bf16.mxu1 %v372_v29 }
  0x4e   :  { %375 = vmatpush3.bf16.msra.mxu1 %v372_v29 }
  0x4f   :  { %377 = vmatprep.subr.bf16.mxu1 %v376_v32 }
  0x52   :  { %379 = vmatpush3.bf16.msra.mxu1 %v376_v32 }
  0x53   :  { %381 = vmatprep.subr.bf16.mxu1 %v380_v39 }
  0x56   :  { %383 = vmatpush3.bf16.msra.mxu1 %v380_v39 }
  0x57   :  { %385 = vmatprep.subr.bf16.mxu1 %v384_v43 }
  0x5a   :  { %387 = vmatpush3.bf16.msra.mxu1 %v384_v43 }
 0x115   :  { %v157_v46 = vpop.f32.mrb[0].mxu0 }
 0x116   :  { %v159_v47 = vpop.f32.mrb[1].mxu0  ;;  %v158_v48 = vadd.f32 %v157_v46, %v77_v45 }
 0x117   :  { %v160_v49 = vadd.f32 %v159_v47, %v81_v40 }
 0x118   :  { %v168_v50 = vmax.f32 %v158_v48, 0.0 }
 0x119   :  { %v163_v51 = vpop.f32.mrb[2].mxu0 }
 0x11a   :  { %v164_v52 = vadd.f32 %v163_v51, %v77_v45  ;;  %v165_v53 = vpop.f32.mrb[3].mxu0  ;;  %345 = vmatprep.mubr.f32.mxu1 %v168_v50 }
 0x11b   :  { %v166_v54 = vadd.f32 %v165_v53, %v81_v40 }
 0x11c   :  { %v169_v55 = vmax.f32 %v164_v52, 0.0 }
 0x11e   :  { %346 = vmatmul.mubr.f32.vlgmr.msra.gmra.mrb[0].mxu1 %v169_v55 }
 0x1f1   :  { %v347_v57 = vpop.f32.mrb[0].mxu1 }
 0x1f2   :  { %v265_v58 = vadd.f32 %v347_v57, %v294_v56  ;;  %v259_v59 = vpop.f32.mrb[1].mxu1 }
 0x1f3   :  { %v260_v60 = vadd.f32 %v294_v56, %v259_v59 }
 0x1f4   :  { %v269_v61 = vadd.f32 %v265_v58, %v166_v54 }
 0x1f5   :  { %v268_v62 = vadd.f32 %v260_v60, %v160_v49 }
 0x1f6   :  { %v271_v63 = vmax.f32 %v269_v61, 0.0 }
 0x1f7   :  { %v270_v0 = vmax.f32 %v268_v62, 0.0 }
 0x1f8   :  { %273 = vst [vmem:[#allocation8 + $0x8] sm:$0xff] %v271_v63 }
 0x1f9   :  { %272 = vst [vmem:[#allocation8] sm:$0xff] %v270_v0 }
 0x1fa   :  { %474 = shalt.err (!%p471_p0)
}
 0x1fb   :  { %s475_s12 = scalar_lea.hbm %s598_s5, 256 }
 0x1fc   :  { %p476_p1 = scmp.ne.s32.totalorder %s598_s5, %s475_s12  ;;  %p479_p2 = scmp.lt.u32.totalorder %s475_s12, %s598_s5 }
 0x1fe   :  { %p481_p3 = pnand %p479_p2, %p476_p1 }
 0x200   :  { %484 = shalt.err (!%p481_p3)
}
 0x201   :  { %285 = dma.vmem_to_hbm [thread:$0]  %s280_s9, 256, %s598_s5, [#allocation4], %s495_s1, %s495_s1, %s496_s17  }
 0x202   :  { %489 = dma.done.wait [#allocation4], 256  }
 0x203   :  { %490 = vsyncadd [#allocation4], 4294967040 }
 0x204   :  { %289 = vsyncpa [#allocation3], 1 }
 0x205   :  { %290 = vsyncpa [#allocation6], 1 }
 0x206   :  { %291 = vsyncpa [#allocation4], 1 }

// kernel: tpu_custom_call.1
= control target key start
LH: loop header
LB: loop body
LE: loop exit
PB: predicated region body
PF: predicated region fallthrough
CT: control target
= control target key end

     0   :  { %10 = vsyncpa [#allocation3], 0  ;;  %s593_s0 = inlined_call_operand.hbm [shape: f32[16,32], index: 0, kind: input, shape index: {}]   ;;  %s594_s1 = inlined_call_operand.hbm [shape: f32[32,256], index: 1, kind: input, shape index: {}]   ;;  %s595_s2 = inlined_call_operand.vmem [shape: f32[1,256], index: 2, kind: input, shape index: {}]   ;;  %s596_s3 = inlined_call_operand.hbm [shape: f32[128,128], index: 3, kind: input, shape index: {}]   ;;  %s597_s4 = inlined_call_operand.vmem [shape: f32[1,128], index: 4, kind: input, shape index: {}]   ;;  %s598_s5 = inlined_call_operand.hbm [shape: f32[16,128], index: 5, kind: output, shape index: {}]  }
   0x1   :  { %11 = vsyncpa [#allocation6], 0 }
   0x2   :  { %12 = vsyncpa [#allocation4], 0  ;;  %s491_s18 = smov [#allocation5]   ;;  %s397_s22 = scalar_lea.hbm %s594_s1, 1024 }
   0x3   :  { %s30_s19 = sshll.u32 %s491_s18, 4  ;;  %p398_p0 = scmp.ne.s32.totalorder %s594_s1, %s397_s22  ;;  %s31_s19 = int_to_ptr.vmem [resolvable:$true] %s30_s19 }
   0x4   :  { %p401_p1 = scmp.lt.u32.totalorder %s397_s22, %s594_s1 }
   0x6   :  { %p403_p2 = pnand %p401_p1, %p398_p0 }
   0x8   :  { %406 = shalt.err (!%p403_p2)
}
   0x9   :  { %s407_s27 = scalar_lea.vmem %s31_s19, 1024  ;;  %p412_p4 = scmp.lt.s32.totalorder %s31_s19, %s31_s19 }
   0xa   :  { %p408_p3 = scmp.ne.s32.totalorder %s31_s19, %s407_s27  ;;  %p413_p5 = scmp.lt.s32.totalorder %s407_s27, %s407_s27 }
   0xc   :  { %p414_p6 = por %p413_p5, %p412_p4 }
   0xe   :  { %p415_p7 = pnand %p414_p6, %p408_p3 }
  0x10   :  { %418 = shalt.err (!%p415_p7)
}
  0x11   :  { %s492_s28 = smov 256   ;;  %s493_s29 = smov 16  }
  0x12   :  { %36 = dma.hbm_to_vmem [thread:$0]  %s594_s1, 1024, %s31_s19, [#allocation6], %s492_s28, %s492_s28, %s493_s29  }
  0x13   :  { %s494_s7 = smov [#allocation2]   ;;  %s419_s11 = scalar_lea.hbm %s593_s0, 256 }
  0x14   :  { %s18_s8 = sshll.u32 %s494_s7, 4  ;;  %p420_p8 = scmp.ne.s32.totalorder %s593_s0, %s419_s11  ;;  %s19_s8 = int_to_ptr.vmem [resolvable:$true] %s18_s8 }
  0x15   :  { %p423_p9 = scmp.lt.u32.totalorder %s419_s11, %s593_s0 }
  0x17   :  { %p425_p10 = pnand %p423_p9, %p420_p8 }
  0x19   :  { %428 = shalt.err (!%p425_p10)
}
  0x1a   :  { %s429_s16 = scalar_lea.vmem %s19_s8, 256  ;;  %p434_p12 = scmp.lt.s32.totalorder %s19_s8, %s19_s8 }
  0x1b   :  { %p430_p11 = scmp.ne.s32.totalorder %s19_s8, %s429_s16  ;;  %p435_p13 = scmp.lt.s32.totalorder %s429_s16, %s429_s16 }
  0x1d   :  { %p436_p0 = por %p435_p13, %p434_p12 }
  0x1f   :  { %p437_p1 = pnand %p436_p0, %p430_p11 }
  0x21   :  { %440 = shalt.err (!%p437_p1)
}
  0x22   :  { %s495_s1 = smov 128   ;;  %s496_s17 = smov 8  }
  0x23   :  { %24 = dma.hbm_to_vmem [thread:$0]  %s593_s0, 256, %s19_s8, [#allocation3], %s495_s1, %s495_s1, %s496_s17  }
  0x24   :  { %s497_s20 = smov [#allocation7]   ;;  %s441_s24 = scalar_lea.hbm %s596_s3, 2048 }
  0x25   :  { %s44_s21 = sshll.u32 %s497_s20, 4  ;;  %p442_p2 = scmp.ne.s32.totalorder %s596_s3, %s441_s24  ;;  %s45_s21 = int_to_ptr.vmem [resolvable:$true] %s44_s21 }
  0x26   :  { %p445_p3 = scmp.lt.u32.totalorder %s441_s24, %s596_s3 }
  0x28   :  { %p447_p4 = pnand %p445_p3, %p442_p2 }
  0x2a   :  { %450 = shalt.err (!%p447_p4)
}
  0x2b   :  { %s451_s29 = scalar_lea.vmem %s45_s21, 2048  ;;  %p456_p6 = scmp.lt.s32.totalorder %s45_s21, %s45_s21 }
  0x2c   :  { %p452_p5 = scmp.ne.s32.totalorder %s45_s21, %s451_s29  ;;  %p457_p7 = scmp.lt.s32.totalorder %s451_s29, %s451_s29 }
  0x2e   :  { %p458_p8 = por %p457_p7, %p456_p6 }
  0x30   :  { %p459_p9 = pnand %p458_p8, %p452_p5 }
  0x32   :  { %462 = shalt.err (!%p459_p9)
}
  0x33   :  { %50 = dma.hbm_to_vmem [thread:$0]  %s596_s3, 2048, %s45_s21, [#allocation6], %s495_s1, %s495_s1, %s496_s17  }
  0x34   :  { %485 = dma.done.wait [#allocation3], 256  }
  0x35   :  { %486 = vsyncadd [#allocation3], 4294967040 }
  0x36   :  { %487 = dma.done.wait [#allocation6], 3072  }
  0x37   :  { %488 = vsyncadd [#allocation6], 4294964224  ;;  %v498_v0 = vmov 0.0   ;;  %v65_v1 = vld [vmem:[#allocation5 + $0x8] sm:$0xff]  ;;  %v67_v2 = vld [vmem:[#allocation5 + $0x18] sm:$0xff]  ;;  %vm84_vm0 = vcmask 261120   ;;  %v74_v33 = vlaneseq }
  0x38   :  { %155 = vmatprep.mubr.f32.mxu0 %v498_v0  ;;  %v64_v3 = vld [vmem:[#allocation5] sm:$0xff]  ;;  %v348_v4 = vpack.c.bf16 %v67_v2, %v65_v1  ;;  %v66_v5 = vld [vmem:[#allocation5 + $0x10] sm:$0xff]  ;;  %v69_v6 = vld [vmem:[#allocation5 + $0x28] sm:$0xff]  ;;  %s499_s8 = smov [#allocation8]  }
  0x39   :  { %v71_v7 = vld [vmem:[#allocation5 + $0x38] sm:$0xff]  ;;  %v350_v8 = vpack.c.bf16 %v66_v5, %v64_v3  ;;  %v68_v10 = vld [vmem:[#allocation5 + $0x20] sm:$0xff]  ;;  %v70_v11 = vld [vmem:[#allocation5 + $0x30] sm:$0xff]  ;;  %v75_v34 = vshrl.u32 %v74_v33, 7  ;;  %s279_s9 = sshll.u32 %s499_s8, 4  ;;  %s280_s9 = int_to_ptr.vmem [resolvable:$true] %s279_s9 }
  0x3a   :  { %v352_v9 = vpack.c.bf16 %v71_v7, %v69_v6  ;;  %349 = vmatprep.subr.bf16.mxu0 %v348_v4  ;;  %v170_v12 = vld [vmem:[#allocation7] sm:$0xff]  ;;  %v171_v13 = vld [vmem:[#allocation7 + $0x8] sm:$0xff]  ;;  %v354_v14 = vpack.c.bf16 %v70_v11, %v68_v10  ;;  %v172_v16 = vld [vmem:[#allocation7 + $0x10] sm:$0xff]  ;;  %s463_s10 = scalar_lea.vmem %s280_s9, 256  ;;  %p468_p11 = scmp.lt.s32.totalorder %s280_s9, %s280_s9 }
  0x3b   :  { %351 = vmatpush1.bf16.msra.mxu0 %v350_v8  ;;  %v356_v15 = vpack.c.bf16 %v171_v13, %v170_v12  ;;  %v173_v17 = vld [vmem:[#allocation7 + $0x18] sm:$0xff]  ;;  %v174_v19 = vld [vmem:[#allocation7 + $0x20] sm:$0xff]  ;;  %v175_v20 = vld [vmem:[#allocation7 + $0x28] sm:$0xff]  ;;  %v80_v36 = vsub.s32 1, %v75_v34  ;;  %v76_v44 = vsub.s32 0, %v75_v34  ;;  %p464_p10 = scmp.ne.s32.totalorder %s280_s9, %s463_s10  ;;  %p469_p12 = scmp.lt.s32.totalorder %s463_s10, %s463_s10 }
  0x3c   :  { %353 = vmatprep.subr.bf16.mxu0 %v352_v9  ;;  %v360_v18 = vpack.c.bf16 %v173_v17, %v172_v16  ;;  %v62_v21 = vld [vmem:[#allocation2] sm:$0xff]  ;;  %v364_v22 = vpack.c.bf16 %v175_v20, %v174_v19  ;;  %v177_v24 = vld [vmem:[#allocation7 + $0x38] sm:$0xff]  ;;  %v178_v27 = vld [vmem:[#allocation7 + $0x40] sm:$0xff] }
  0x3d   :  { %357 = vmatprep.subr.bf16.mxu1 %v356_v15  ;;  %v176_v23 = vld [vmem:[#allocation7 + $0x30] sm:$0xff]  ;;  %v63_v25 = vld [vmem:[#allocation2 + $0x8] sm:$0xff]  ;;  %v179_v28 = vld [vmem:[#allocation7 + $0x48] sm:$0xff]  ;;  %p470_p13 = por %p469_p12, %p468_p11 }
  0x3e   :  { %359 = vmatpush3.bf16.msra.mxu1 %v356_v15  ;;  %v368_v26 = vpack.c.bf16 %v177_v24, %v176_v23  ;;  %v372_v29 = vpack.c.bf16 %v179_v28, %v178_v27  ;;  %v180_v30 = vld [vmem:[#allocation7 + $0x50] sm:$0xff]  ;;  %v181_v31 = vld [vmem:[#allocation7 + $0x58] sm:$0xff]  ;;  %v182_v37 = vld [vmem:[#allocation7 + $0x60] sm:$0xff] }
  0x3f   :  { %355 = vmatpush1.bf16.msra.mxu0 %v354_v14  ;;  %361 = vmatprep.subr.bf16.mxu1 %v360_v18  ;;  %v376_v32 = vpack.c.bf16 %v181_v31, %v180_v30  ;;  %v72_v35 = vld [vmem:[%s595_s2] sm:$0x3]  ;;  %v183_v38 = vld [vmem:[#allocation7 + $0x68] sm:$0xff]  ;;  %v185_v42 = vld [vmem:[#allocation7 + $0x78] sm:$0xff]  ;;  %p471_p0 = pnand %p470_p13, %p464_p10 }
  0x40   :  { %v380_v39 = vpack.c.bf16 %v183_v38, %v182_v37  ;;  %v81_v40 = vrot.slane %v72_v35, %v80_v36  ;;  %v184_v41 = vld [vmem:[#allocation7 + $0x70] sm:$0xff]  ;;  %v77_v45 = vrot.slane %v72_v35, %v76_v44 }
  0x41   :  { %v384_v43 = vpack.c.bf16 %v185_v42, %v184_v41  ;;  %v294_v56 = vld [vmem:[%s597_s4] ss:$0 sm:$0xff] }
  0x42   :  { %292 = vmatmul.mubr.msk.f32.vlgmr.msra.gmra.mrb[0].mxu0 %vm84_vm0, %v62_v21  ;;  %363 = vmatpush3.bf16.msra.mxu1 %v360_v18 }
  0x43   :  { %161 = vmatprep.mubr.f32.mxu0 %v498_v0  ;;  %365 = vmatprep.subr.bf16.mxu1 %v364_v22 }
  0x46   :  { %293 = vmatmul.mubr.msk.f32.gmra.mrb[2].mxu0 %vm84_vm0, %v63_v25  ;;  %367 = vmatpush3.bf16.msra.mxu1 %v364_v22 }
  0x47   :  { %369 = vmatprep.subr.bf16.mxu1 %v368_v26 }
  0x4a   :  { %371 = vmatpush3.bf16.msra.mxu1 %v368_v26 }
  0x4b   :  { %373 = vmatprep.subr.bf16.mxu1 %v372_v29 }
  0x4e   :  { %375 = vmatpush3.bf16.msra.mxu1 %v372_v29 }
  0x4f   :  { %377 = vmatprep.subr.bf16.mxu1 %v376_v32 }
  0x52   :  { %379 = vmatpush3.bf16.msra.mxu1 %v376_v32 }
  0x53   :  { %381 = vmatprep.subr.bf16.mxu1 %v380_v39 }
  0x56   :  { %383 = vmatpush3.bf16.msra.mxu1 %v380_v39 }
  0x57   :  { %385 = vmatprep.subr.bf16.mxu1 %v384_v43 }
  0x5a   :  { %387 = vmatpush3.bf16.msra.mxu1 %v384_v43 }
 0x115   :  { %v157_v46 = vpop.f32.mrb[0].mxu0 }
 0x116   :  { %v159_v47 = vpop.f32.mrb[1].mxu0  ;;  %v158_v48 = vadd.f32 %v157_v46, %v77_v45 }
 0x117   :  { %v160_v49 = vadd.f32 %v159_v47, %v81_v40 }
 0x118   :  { %v168_v50 = vmax.f32 %v158_v48, 0.0 }
 0x119   :  { %v163_v51 = vpop.f32.mrb[2].mxu0 }
 0x11a   :  { %v164_v52 = vadd.f32 %v163_v51, %v77_v45  ;;  %v165_v53 = vpop.f32.mrb[3].mxu0  ;;  %345 = vmatprep.mubr.f32.mxu1 %v168_v50 }
 0x11b   :  { %v166_v54 = vadd.f32 %v165_v53, %v81_v40 }
 0x11c   :  { %v169_v55 = vmax.f32 %v164_v52, 0.0 }
 0x11e   :  { %346 = vmatmul.mubr.f32.vlgmr.msra.gmra.mrb[0].mxu1 %v169_v55 }
 0x1f1   :  { %v347_v57 = vpop.f32.mrb[0].mxu1 }
 0x1f2   :  { %v265_v58 = vadd.f32 %v347_v57, %v294_v56  ;;  %v259_v59 = vpop.f32.mrb[1].mxu1 }
 0x1f3   :  { %v260_v60 = vadd.f32 %v294_v56, %v259_v59 }
 0x1f4   :  { %v269_v61 = vadd.f32 %v265_v58, %v166_v54 }
 0x1f5   :  { %v268_v62 = vadd.f32 %v260_v60, %v160_v49 }
 0x1f6   :  { %v271_v63 = vmax.f32 %v269_v61, 0.0 }
 0x1f7   :  { %v270_v0 = vmax.f32 %v268_v62, 0.0 }
 0x1f8   :  { %273 = vst [vmem:[#allocation8 + $0x8] sm:$0xff] %v271_v63 }
 0x1f9   :  { %272 = vst [vmem:[#allocation8] sm:$0xff] %v270_v0 }
 0x1fa   :  { %474 = shalt.err (!%p471_p0)
}
 0x1fb   :  { %s475_s12 = scalar_lea.hbm %s598_s5, 256 }
 0x1fc   :  { %p476_p1 = scmp.ne.s32.totalorder %s598_s5, %s475_s12  ;;  %p479_p2 = scmp.lt.u32.totalorder %s475_s12, %s598_s5 }
 0x1fe   :  { %p481_p3 = pnand %p479_p2, %p476_p1 }
 0x200   :  { %484 = shalt.err (!%p481_p3)
}
 0x201   :  { %285 = dma.vmem_to_hbm [thread:$0]  %s280_s9, 256, %s598_s5, [#allocation4], %s495_s1, %s495_s1, %s496_s17  }
 0x202   :  { %489 = dma.done.wait [#allocation4], 256  }
 0x203   :  { %490 = vsyncadd [#allocation4], 4294967040 }
 0x204   :  { %289 = vsyncpa [#allocation3], 1 }
 0x205   :  { %290 = vsyncpa [#allocation6], 1 }
 0x206   :  { %291 = vsyncpa [#allocation4], 1 }

</bundles_post_ra>
